<compile_context>
chip_gen: v5e
topology: v5e:2x2
jax: 0.10.0
libtpu: 0.0.40
codegen_flags: <defaults>
</compile_context>

<pallas_src>
import functools

import jax
import jax.numpy as jnp
import numpy as np
from jax import lax
from jax.experimental import pallas as pl
from jax.experimental.pallas import tpu as pltpu


def _round_up(x, m):
    return ((x + m - 1) // m) * m


def _mha_kernel(x_ref, wqkv_ref, o_ref, qkv_ref, *, d, dp, mxu_dtype):
    """One grid step = a block of `block_b` batch elements.

    x_ref    : VMEM f32 [Bblk, T, E]
    wqkv_ref : VMEM f32 [E, 3*Dp]       (fused, column-padded [Wq*inv_sqrt_dk | Wk | Wv])
    o_ref    : VMEM f32 [Bblk, T, D]
    qkv_ref  : VMEM f32 [Bblk*T, 3*Dp]  scratch holding the fused projection
    """
    bblk, t, e = x_ref.shape

    # Fused QKV projection on the flattened slab: one MXU stream, M = Bblk*T.
    x2d = x_ref[...].reshape(bblk * t, e)
    qkv_ref[...] = jnp.dot(x2d, wqkv_ref[...], preferred_element_type=jnp.float32)

    row = lax.broadcasted_iota(jnp.int32, (t, t), 0)
    col = lax.broadcasted_iota(jnp.int32, (t, t), 1)
    causal = col > row

    # fori_loop (not a static unroll) so only ONE set of [T,T]/[T,Dp] tiles is live
    # at a time, independent of bblk.
    def body(i, carry):
        base = pl.multiple_of(i * t, t)
        q = qkv_ref[pl.ds(base, t), pl.ds(0 * dp, dp)]        # [T, Dp] lane-aligned
        k = qkv_ref[pl.ds(base, t), pl.ds(1 * dp, dp)]
        v = qkv_ref[pl.ds(base, t), pl.ds(2 * dp, dp)]

        if mxu_dtype is None:
            eq, ek = q, k
        else:
            eq, ek = q.astype(mxu_dtype), k.astype(mxu_dtype)

        # energy = (Q / sqrt(dk)) @ K^T -- contract the LAST axis of both, so no
        # transpose of K is materialized.  Scale already folded into Wq.
        energy = lax.dot_general(
            eq, ek,
            dimension_numbers=(((1,), (1,)), ((), ())),
            preferred_element_type=jnp.float32)                # [T, T]

        # Padding-length heuristic of the module, computed on the REAL energy row 0
        # (one XLU cross-lane reduce; no wrapper-side K projection needed).
        length = jnp.sum((energy[0:1, :] != 0.0).astype(jnp.int32),
                         axis=-1, keepdims=True)               # [1, 1]

        mask = causal | (col >= length)
        energy = jnp.where(mask, -jnp.inf, energy)

        # Numerically-stable softmax; -inf rows (length==0) yield NaN exactly like
        # the torch reference.
        m = jnp.max(energy, axis=-1, keepdims=True)
        p = jnp.exp(energy - m)
        s = jnp.sum(p, axis=-1, keepdims=True)
        score = p * pl.reciprocal(s, approx=False)

        if mxu_dtype is None:
            oq, ov = score, v
        else:
            oq, ov = score.astype(mxu_dtype), v.astype(mxu_dtype)

        out_tile = jnp.dot(oq, ov, preferred_element_type=jnp.float32)  # [T, Dp]
        o_ref[i] = out_tile[:, :d]                             # store the D useful lanes
        return carry

    lax.fori_loop(0, bblk, body, 0)


def multihead_att_pallas(x, wq, wk, wv, dk, *, block_b=None, mxu_dtype=None):
    """x: [B, T, E]; wq/wk/wv: [E, D] with D = dk*num_heads. Returns [B, T, D] f32."""
    B, T, E = x.shape
    D = wq.shape[1]
    Dp = _round_up(D, 128)                 # lane-aligned per-projection width

    # Fold the softmax temperature into Wq: removes a full [T,T] VALU multiply per
    # batch element; -inf masking and the !=0 length heuristic are scale-invariant.
    # (In production this fused/padded weight would be built once, not per call.)
    wq_scaled = wq * jnp.float32(1.0 / np.sqrt(dk))
    pad_cols = ((0, 0), (0, Dp - D))
    wqkv = jnp.concatenate(
        [jnp.pad(wq_scaled, pad_cols), jnp.pad(wk, pad_cols), jnp.pad(wv, pad_cols)],
        axis=1)                            # [E, 3*Dp]

    # ---- block_b selection: fill the MXU M dimension, respect VMEM, keep >=2 steps.
    if block_b is None:
        block_b = min(B, max(1, -(-256 // T)))      # ~256 flattened rows per step
        if B >= 2:
            block_b = min(block_b, max(1, B // 2))  # >=2 grid steps (v7x has 2 TCs)
    block_b = max(1, min(block_b, B))

    def _footprint(bb):
        x_blk = 2 * bb * T * E * 4                  # double-buffered input block
        o_blk = 2 * bb * T * D * 4                  # double-buffered output block
        w_blk = 2 * E * 3 * Dp * 4                  # fused weight (grid-invariant)
        qkv = bb * T * 3 * Dp * 4                   # VMEM scratch slab
        attn = 4 * T * T * 4 + 4 * T * Dp * 4       # energy/p/mask temps + q/k/v/out
        return x_blk + o_blk + w_blk + qkv + attn

    try:
        phys_vmem = int(pltpu.get_tpu_info().vmem_capacity_bytes)
    except Exception:
        phys_vmem = 64 << 20                        # conservative: v7x per-TC VMEM
    budget = (phys_vmem * 3) // 4                   # leave compiler-scratch headroom
    while block_b > 1 and _footprint(block_b) > budget:
        block_b -= 1
    vmem_limit = int(min(budget, max(2 * _footprint(block_b) + (4 << 20), 32 << 20)))

    # Pad the batch to a multiple of block_b instead of shrinking block_b to 1 for
    # odd/prime B.  Padded (all-zero) rows produce NaN outputs (length==0, matching
    # torch semantics) and are sliced off below.
    grid_b = -(-B // block_b)
    Bp = grid_b * block_b
    if Bp != B:
        x = jnp.pad(x, ((0, Bp - B), (0, 0), (0, 0)))

    kernel = functools.partial(_mha_kernel, d=D, dp=Dp, mxu_dtype=mxu_dtype)

    out = pl.pallas_call(
        kernel,
        out_shape=jax.ShapeDtypeStruct((Bp, T, D), jnp.float32),
        grid_spec=pltpu.PrefetchScalarGridSpec(
            num_scalar_prefetch=0,
            grid=(grid_b,),
            in_specs=[
                pl.BlockSpec((block_b, T, E), lambda b: (b, 0, 0)),
                pl.BlockSpec((E, 3 * Dp), lambda b: (0, 0)),
            ],
            out_specs=pl.BlockSpec((block_b, T, D), lambda b: (b, 0, 0)),
            scratch_shapes=[pltpu.VMEM((block_b * T, 3 * Dp), jnp.float32)],
        ),
        compiler_params=pltpu.CompilerParams(
            dimension_semantics=("parallel",),
            vmem_limit_bytes=vmem_limit,
        ),
    )(x, wqkv)

    return out[:B] if Bp != B else out


def multihead_att_ref(x, wq, wk, wv, dk):
    """Pure-JAX reference mirroring the PyTorch forward."""
    q = x @ wq
    k = x @ wk
    v = x @ wv
    energy = jnp.einsum("btd,bsd->bts", q, k)
    lengths = jnp.sum(energy[:, 0] != 0, axis=-1)      # [B]
    T = energy.shape[1]
    row = jnp.arange(T)[None, :, None]
    col = jnp.arange(T)[None, None, :]
    pad_mask = col >= lengths[:, None, None]
    causal_mask = col > row
    energy = jnp.where(pad_mask | causal_mask, -jnp.inf, energy)
    score = jax.nn.softmax(energy / jnp.sqrt(jnp.float32(dk)), axis=-1)
    return jnp.einsum("bts,bsd->btd", score, v)


if __name__ == "__main__":
    # Small shapes consistent with the module.
    B, T = 2, 8
    embedding_dim = 32
    dk = 8
    num_heads = 4
    D = dk * num_heads  # 32

    key = jax.random.PRNGKey(0)
    kx, kq, kk, kv = jax.random.split(key, 4)

    x = jax.random.normal(kx, (B, T, embedding_dim), dtype=jnp.float32)
    # Deterministic synthetic weights (nn.Linear-like scale), stored as [E, D].
    scale = 1.0 / np.sqrt(embedding_dim)
    wq = jax.random.uniform(kq, (embedding_dim, D), jnp.float32, -scale, scale)
    wk = jax.random.uniform(kk, (embedding_dim, D), jnp.float32, -scale, scale)
    wv = jax.random.uniform(kv, (embedding_dim, D), jnp.float32, -scale, scale)

    out = multihead_att_pallas(x, wq, wk, wv, dk)
    out = jax.block_until_ready(out)

    ref = multihead_att_ref(x, wq, wk, wv, dk)
    np.testing.assert_allclose(np.asarray(out), np.asarray(ref), rtol=1e-4, atol=1e-5)

    print("KERNEL_OK")
</pallas_src>

<mosaic_0001>
module attributes {stable_mosaic.version = 11 : i64} {
  func.func @_mha_kernel(%arg0: i32, %arg1: memref<1x8x32xf32, #tpu.memory_space<vmem>>, %arg2: memref<32x384xf32, #tpu.memory_space<vmem>>, %arg3: memref<1x8x32xf32, #tpu.memory_space<vmem>>, %arg4: memref<8x384xf32, #tpu.memory_space<vmem>>) attributes {dimension_semantics = [#tpu.dimension_semantics<parallel>], iteration_bounds = array<i64: 2>, scalar_prefetch = 0 : i64, scratch_operands = 1 : i64, tpu.core_type = #tpu.core_type<tc>, window_params = [{transform_indices = @transform_0, window_bounds = array<i64: 1, 8, 32>}, {pipeline_mode = #tpu.pipeline_mode<synchronous>, transform_indices = @transform_1, window_bounds = array<i64: 32, 384>}, {transform_indices = @transform_2, window_bounds = array<i64: 1, 8, 32>}]} {
    %c0 = arith.constant 0 : index
    %c0_0 = arith.constant 0 : index
    %c0_1 = arith.constant 0 : index
    %0 = vector.load %arg1[%c0, %c0_0, %c0_1] : memref<1x8x32xf32, #tpu.memory_space<vmem>>, vector<1x8x32xf32>
    %1 = vector.shape_cast %0 : vector<1x8x32xf32> to vector<8x32xf32>
    %c0_2 = arith.constant 0 : index
    %c0_3 = arith.constant 0 : index
    %2 = vector.load %arg2[%c0_2, %c0_3] : memref<32x384xf32, #tpu.memory_space<vmem>>, vector<32x384xf32>
    %cst = arith.constant dense<0.000000e+00> : vector<8x384xf32>
    %3 = tpu.matmul %1, %2, %cst {dimension_numbers = #tpu.dot_dimension_numbers<[1], [0], [0], [1], [0, 0, 1, 1], [], []>} : vector<8x32xf32>, vector<32x384xf32>, vector<8x384xf32> -> vector<8x384xf32>
    %c0_4 = arith.constant 0 : index
    %c0_5 = arith.constant 0 : index
    %4 = vector.load %arg4[%c0_4, %c0_5] : memref<8x384xf32, #tpu.memory_space<vmem>>, vector<8x384xf32>
    tpu.vector_store %arg4[%c0_4, %c0_5], %3 {strides = array<i32>} : memref<8x384xf32, #tpu.memory_space<vmem>>, vector<8x384xf32>,
    %5 = tpu.iota {dimensions = array<i32: 0>} : vector<8x8xi32>
    %6 = tpu.iota {dimensions = array<i32: 1>} : vector<8x8xi32>
    %7 = arith.cmpi sgt, %6, %5 : vector<8x8xi32>
    %c0_i32 = arith.constant 0 : i32
    %c8_i32 = arith.constant 8 : i32
    %8 = arith.muli %c0_i32, %c8_i32 : i32
    %9 = tpu.assume_multiple %8, 8 : i32
    %10 = arith.index_cast %9 : i32 to index
    %c0_6 = arith.constant 0 : index
    %11 = vector.load %arg4[%10, %c0_6] : memref<8x384xf32, #tpu.memory_space<vmem>>, vector<8x128xf32>
    %12 = arith.index_cast %9 : i32 to index
    %c128 = arith.constant 128 : index
    %13 = vector.load %arg4[%12, %c128] : memref<8x384xf32, #tpu.memory_space<vmem>>, vector<8x128xf32>
    %14 = arith.index_cast %9 : i32 to index
    %c256 = arith.constant 256 : index
    %15 = vector.load %arg4[%14, %c256] : memref<8x384xf32, #tpu.memory_space<vmem>>, vector<8x128xf32>
    %cst_7 = arith.constant dense<0.000000e+00> : vector<8x8xf32>
    %16 = tpu.matmul %11, %13, %cst_7 {dimension_numbers = #tpu.dot_dimension_numbers<[1], [1], [0], [0], [0, 0, 1, 0], [], []>} : vector<8x128xf32>, vector<8x128xf32>, vector<8x8xf32> -> vector<8x8xf32>
    %17 = vector.extract_strided_slice %16 {offsets = [0, 0], sizes = [1, 8], strides = [1, 1]} : vector<8x8xf32> to vector<1x8xf32>
    %cst_8 = arith.constant 0.000000e+00 : f32
    %18 = vector.broadcast %cst_8 : f32 to vector<1x8xf32>
    %19 = arith.cmpf one, %17, %18 : vector<1x8xf32>
    %20 = arith.extui %19 : vector<1x8xi1> to vector<1x8xi32>
    %cst_9 = arith.constant dense<0> : vector<1xi32>
    %21 = vector.multi_reduction <add>, %20, %cst_9 [1] : vector<1x8xi32> to vector<1xi32>
    %22 = vector.shape_cast %21 : vector<1xi32> to vector<1x1xi32>
    %23 = vector.broadcast %22 : vector<1x1xi32> to vector<8x8xi32>
    %24 = arith.cmpi sge, %6, %23 : vector<8x8xi32>
    %25 = arith.ori %7, %24 : vector<8x8xi1>
    %cst_10 = arith.constant 0xFF800000 : f32
    %26 = vector.broadcast %cst_10 : f32 to vector<8x8xf32>
    %27 = arith.select %25, %26, %16 : vector<8x8xi1>, vector<8x8xf32>
    %cst_11 = arith.constant dense<0xFF800000> : vector<8xf32>
    %28 = vector.multi_reduction <maximumf>, %27, %cst_11 [1] : vector<8x8xf32> to vector<8xf32>
    %29 = vector.shape_cast %28 : vector<8xf32> to vector<8x1xf32>
    %30 = vector.broadcast %29 : vector<8x1xf32> to vector<8x8xf32>
    %31 = arith.subf %27, %30 : vector<8x8xf32>
    %32 = math.exp %31 : vector<8x8xf32>
    %cst_12 = arith.constant dense<0.000000e+00> : vector<8xf32>
    %33 = vector.multi_reduction <add>, %32, %cst_12 [1] : vector<8x8xf32> to vector<8xf32>
    %34 = vector.shape_cast %33 : vector<8xf32> to vector<8x1xf32>
    %35 = tpu.reciprocal %34 : vector<8x1xf32> -> vector<8x1xf32>
    %36 = vector.broadcast %35 : vector<8x1xf32> to vector<8x8xf32>
    %37 = arith.mulf %32, %36 : vector<8x8xf32>
    %cst_13 = arith.constant dense<0.000000e+00> : vector<8x128xf32>
    %38 = tpu.matmul %37, %15, %cst_13 {dimension_numbers = #tpu.dot_dimension_numbers<[1], [0], [0], [1], [0, 0, 1, 1], [], []>} : vector<8x8xf32>, vector<8x128xf32>, vector<8x128xf32> -> vector<8x128xf32>
    %39 = vector.extract_strided_slice %38 {offsets = [0, 0], sizes = [8, 32], strides = [1, 1]} : vector<8x128xf32> to vector<8x32xf32>
    %40 = arith.index_cast %c0_i32 : i32 to index
    %c0_14 = arith.constant 0 : index
    %c0_15 = arith.constant 0 : index
    %41 = vector.load %arg3[%40, %c0_14, %c0_15] : memref<1x8x32xf32, #tpu.memory_space<vmem>>, vector<1x8x32xf32>
    %42 = vector.shape_cast %41 : vector<1x8x32xf32> to vector<8x32xf32>
    %43 = vector.shape_cast %39 : vector<8x32xf32> to vector<1x8x32xf32>
    tpu.vector_store %arg3[%40, %c0_14, %c0_15], %43 {strides = array<i32>} : memref<1x8x32xf32, #tpu.memory_space<vmem>>, vector<1x8x32xf32>,
    %c1_i32 = arith.constant 1 : i32
    return
  }
  func.func @transform_0(%arg0: i32) -> (i32, i32, i32) {
    %c0_i32 = arith.constant 0 : i32
    %c0_i32_0 = arith.constant 0 : i32
    %c0_i32_1 = arith.constant 0 : i32
    return %arg0, %c0_i32, %c0_i32_0 : i32, i32, i32
  }
  func.func @transform_1(%arg0: i32) -> (i32, i32) {
    %c0_i32 = arith.constant 0 : i32
    %c0_i32_0 = arith.constant 0 : i32
    %c0_i32_1 = arith.constant 0 : i32
    return %c0_i32, %c0_i32_0 : i32, i32
  }
  func.func @transform_2(%arg0: i32) -> (i32, i32, i32) {
    %c0_i32 = arith.constant 0 : i32
    %c0_i32_0 = arith.constant 0 : i32
    %c0_i32_1 = arith.constant 0 : i32
    return %arg0, %c0_i32, %c0_i32_0 : i32, i32, i32
  }
}

</mosaic_0001>

<bundles_post_ra>
// kernel: tpu_custom_call.1
= control target key start
LH: loop header
LB: loop body
LE: loop exit
PB: predicated region body
PF: predicated region fallthrough
CT: control target
= control target key end

     0   :  { %7 = vsyncpa [#allocation4], 0  ;;  %s834_s0 = inlined_call_operand.hbm [shape: f32[2,8,32], index: 0, kind: input, shape index: {}]   ;;  %s835_s1 = inlined_call_operand.hbm [shape: f32[32,384], index: 1, kind: input, shape index: {}]   ;;  %s836_s2 = inlined_call_operand.hbm [shape: f32[2,8,32], index: 2, kind: output, shape index: {}]  }
   0x1   :  { %9 = vsyncpa [#allocation4 + $0x1], 0 }
   0x2   :  { %10 = vsyncpa [#allocation7], 0 }
   0x3   :  { %11 = vsyncpa [#allocation5], 0 }
   0x4   :  { %13 = vsyncpa [#allocation5 + $0x1], 0  ;;  %s687_s9 = smov 0   ;;  %s689_s10 = smov 0  }
   0x5   :  { %s691_s11 = smov 0   ;;  %s693_s12 = smov 0  }
   0x6 LB: > { %s108_s15 = sshll.u32 %s835_s1, 4  ;;  %s711_s16 = sadd.s32 4294967295, %s666_s12   ;;  %s666_s12 = sphi %s693_s12, %s846_s12   ;;  %s662_s11 = sphi %s691_s11, %s845_s11   ;;  %s658_s10 = sphi %s689_s10, %s844_s10   ;;  %s654_s9 = sphi %s687_s9, %s843_s9   ;;  %s109_s15 = int_to_ptr.hbm [resolvable:$true] %s108_s15 }
   0x7   : > { %p455_p0 = scmp.ge.s32.totalorder %s666_s12, 1  ;;  %p40_p1 = scmp.eq.s32.totalorder %s711_s16, 0 }
   0x8   : > { %p97_p2 = scmp.lt.s32.totalorder %s666_s12, 3  ;;  %s668_s18 = smov [#allocation6]  }
   0x9   : > { %s110_s19 = sshll.u32 %s668_s18, 4  ;;  %s669_s20 = smov 384   ;;  %s111_s19 = int_to_ptr.vmem [resolvable:$true] %s110_s19 }
   0xa   : > { %p716_p3 = pnand %p455_p0, %p97_p2  ;;  %s670_s21 = smov 24  }
   0xb   : > { %s454_s22 = sadd.s32 4294967294, %s666_s12   ;;  %s727_s23 = sadd.s32 1, %s666_s12  }
   0xc   : > { %p480_p4 = pneg %p716_p3  ;;  %s26_s24 = sadd.s32 1, %s662_s11 }
   0xd   : > { %s23_s25 = ssub.s32 %s666_s12, %s727_s23  ;;  %p33_p7 = scmp.ne.s32.totalorder %s662_s11, %s658_s10 }
   0xe   : > { %p481_p6 = pnand %p480_p4, %p40_p1  ;;  %p24_p8 = scmp.eq.s32.totalorder %s23_s25, 0 }
   0xf   : > { %p34_p9 = scmp.eq.s32.totalorder %s666_s12, 0  ;;  %p39_p10 = scmp.ne.s32.totalorder %s658_s10, %s654_s9 }
  0x10   : > { %483 = dma.hbm_to_vmem [thread:$0]  (!%p481_p6), %s109_s15, 1536, %s111_s19, [#allocation7], %s669_s20, %s669_s20, %s670_s21  }
  0x11   : > { %p84_p11 = scmp.eq.s32.totalorder %s711_s16, 1  ;;  %p743_p12 = por %p40_p1, %p39_p10 }
  0x12   : > { %s739_s26 = scalar_select %p24_p8, %s662_s11, %s26_s24  }
  0x13   : > { %p747_p13 = por %p84_p11, %p33_p7  ;;  %p90_p0 = scmp.eq.s32.totalorder %s454_s22, 1 }
  0x14   : > { %p35_p2 = por %p34_p9, %p33_p7  ;;  %s124_s29 = sand.u32 1, %s662_s11  }
  0x15   : > { %p752_p4 = por %p90_p0, %p39_p10  ;;  %p493_p6 = scmp.lt.s32.totalorder %s666_s12, 2 }
  0x16   : > { %s458_s3 = sshll.u32 %s124_s29, 3  ;;  %s459_s4 = sshll.u32 %s666_s12, 3 }
  0x17   : > { %s132_s7 = scalar_lea.hbm %s834_s0, %s459_s4  ;;  %s128_s13 = scalar_lea.vmem [#allocation3], %s458_s3 }
  0x18   : > { %s134_s8 = sshll.u32 %s132_s7, 4  ;;  %s136_s14 = sshll.u32 %s128_s13, 4  ;;  %s135_s8 = int_to_ptr.hbm [resolvable:$true] %s134_s8  ;;  %s137_s14 = int_to_ptr.vmem [resolvable:$true] %s136_s14 }
  0x19   : > { %p761_p8 = pnand %p493_p6, %p35_p2  ;;  %s125_s18 = scalar_lea.sflag [#allocation4], %s124_s29 }
  0x1a   : > { %s566_s19 = sshra.s32 %s135_s8, 4  ;;  %s573_s24 = scalar_lea.hbm %s834_s0, 16  ;;  %s567_s19 = int_to_ptr.hbm [resolvable:$true] %s566_s19 }
  0x1b   : > { %s568_s20 = scalar_lea.hbm %s567_s19, 8  ;;  %p570_p9 = pneg %p761_p8 }
  0x1c   : > { %p569_p7 = scmp.ne.s32.totalorder %s567_s19, %s568_s20  ;;  %p574_p0 = scmp.lt.s32.totalorder %s567_s19, %s834_s0 }
  0x1d   : > { %p575_p2 = scmp.lt.s32.totalorder %s573_s24, %s568_s20 }
  0x1e   : > { %p571_p10 = pnand %p570_p9, %p569_p7 }
  0x1f   : > { %p576_p6 = por %p575_p2, %p574_p0 }
  0x20   : > { %p572_p11 = pneg %p571_p10 }
  0x22   : > { %p577_p5 = pnand %p576_p6, %p572_p11 }
  0x24   : > { %580 = shalt.err (!%p577_p5)
}
  0x25   : > { %487 = dma.hbm_to_vmem [thread:$0]  (!%p761_p8), %s135_s8, 128, %s137_s14, %s125_s18  }
  0x26   : > { %145 = sbr.rel (%p716_p3) target bundleno = 854 (0x356), region = 28  ;;  %s778_s29 = sand.u32 (!%p716_p3), 1, %s658_s10  }
  0x27   : > { %s461_s4 = sshll.u32 (!%p716_p3), %s778_s29, 3  ;;  %s148_s5 = scalar_lea.sflag (!%p716_p3), [#allocation4], %s778_s29 }
  0x28   : > { %s151_s6 = scalar_lea.vmem (!%p716_p3), [#allocation3], %s461_s4 }
  0x2b   : > { %641 = dma.done.wait (%p743_p12), %s148_s5, 128  }
  0x2c   : > { %643 = vsyncadd (%p743_p12), %s148_s5, 4294967168 }
  0x2d   : > { %645 = dma.done.wait (%p40_p1), [#allocation7], 1536  }
  0x2e   : > { %647 = vsyncadd (%p40_p1), [#allocation7], 4294965760  ;;  %v189_v0 = vld [vmem:[#allocation6 + $0x50] sm:$0xff]  ;;  %v186_v1 = vld [vmem:[#allocation6 + $0x38] sm:$0xff]  ;;  %vm191_vm0 = vcmask 261120   ;;  %vm291_vm1 = vcmask 57344   ;;  %v258_v21 = vlaneseq }
  0x2f   : > { %v188_v2 = vld [vmem:[#allocation6 + $0x48] sm:$0xff]  ;;  %227 = vmatpush.msra.mxu1 %v189_v0  ;;  %v185_v3 = vld [vmem:[#allocation6 + $0x30] sm:$0xff]  ;;  %v183_v4 = vld [vmem:[#allocation6 + $0x20] sm:$0xff]  ;;  %v671_v12 = vmov 0   ;;  %vm309_vm5 = vcmask 64512   ;;  %s469_s17 = sshll.u32 %s711_s16, 3 }
  0x30   : > { %207 = vmatpush.msra.mxu0 %v188_v2  ;;  %v182_v5 = vld [vmem:[#allocation6 + $0x18] sm:$0xff]  ;;  %v180_v6 = vld [vmem:[#allocation6 + $0x8] sm:$0xff]  ;;  %v179_v7 = vld [vmem:[#allocation6] sm:$0xff]  ;;  %v259_v25 = vshrl.u32 %v258_v21, 7  ;;  %v261_v26 = vand.u32 127, %v258_v21  ;;  %s369_s8 = scalar_lea.hbm %s836_s2, %s469_s17  ;;  %s177_s13 = scalar_lea.vmem [#allocation8], %s461_s4 }
  0x31   : > { %228 = vmatpush.msra.mxu1 %v186_v1  ;;  %v178_v8 = vld [vmem:[%s151_s6] sm:$0xff]  ;;  %v187_v32 = vld [vmem:[#allocation6 + $0x40] sm:$0xff]  ;;  %v184_v33 = vld [vmem:[#allocation6 + $0x28] sm:$0xff]  ;;  %s371_s14 = sshll.u32 %s177_s13, 4  ;;  %s373_s15 = sshll.u32 %s369_s8, 4  ;;  %s372_s14 = int_to_ptr.vmem [resolvable:$true] %s371_s14  ;;  %s374_s15 = int_to_ptr.hbm [resolvable:$true] %s373_s15 }
  0x32   : > { %208 = vmatpush.msra.mxu0 %v185_v3  ;;  %vm262_vm3 = vcmp.gt.s32.totalorder %v261_v26, %v259_v25  ;;  %v190_v31 = vld [vmem:[#allocation6 + $0x58] sm:$0xff]  ;;  %v181_v34 = vld [vmem:[#allocation6 + $0x10] sm:$0xff]  ;;  %s359_s18 = scalar_lea.sflag [#allocation5], %s778_s29  ;;  %s610_s19 = sshra.s32 %s374_s15, 4  ;;  %s611_s19 = int_to_ptr.hbm [resolvable:$true] %s610_s19 }
  0x33   : > { %229 = vmatpush.msra.mxu1 %v183_v4  ;;  %247 = vmatpush.msra.mxu2 %v190_v31  ;;  %s612_s20 = scalar_lea.hbm %s611_s19, 8  ;;  %s616_s22 = scalar_lea.hbm %s836_s2, 16 }
  0x34   : > { %209 = vmatpush.msra.mxu0 %v182_v5  ;;  %p613_p1 = scmp.ne.s32.totalorder %s611_s19, %s612_s20  ;;  %p617_p12 = scmp.lt.s32.totalorder %s611_s19, %s836_s2 }
  0x35   : > { %230 = vmatpush.msra.mxu1 %v180_v6  ;;  %248 = vmatpush.msra.mxu2 %v187_v32  ;;  %p618_p8 = scmp.lt.s32.totalorder %s616_s22, %s612_s20 }
  0x36   : > { %210 = vmatpush.msra.mxu0 %v179_v7  ;;  %465 = vmatmul.msk.f32.vlgmr.msra.gmra.mxu1 %vm191_vm0, %v178_v8  ;;  %p614_p3 = pnand %p613_p1, %p747_p13 }
  0x37   : > { %464 = vmatmul.msk.f32.vlgmr.msra.gmra.mxu0 %vm191_vm0, %v178_v8  ;;  %249 = vmatpush.msra.mxu2 %v184_v33  ;;  %p619_p7 = por %p618_p8, %p617_p12 }
  0x38   : > { %p615_p5 = pneg %p614_p3 }
  0x39   : > { %250 = vmatpush.msra.mxu2 %v181_v34 }
  0x3a   : > { %466 = vmatmul.msk.f32.vlgmr.msra.gmra.mxu2 %vm191_vm0, %v178_v8  ;;  %p620_p9 = pnand %p619_p7, %p615_p5 }
  0xb3   : > { %v232_v9 = vpop.f32.mrf.mxu1 }
  0xb4   : > { %284 = vmatpush.xpose.msra.mxu3 %v232_v9  ;;  %v212_v10 = vpop.f32.mrf.mxu0 }
  0xb7   : > { %285 = vmatmul.f32.vlgmr.msra.gmra.mxu3 %v212_v10 }
  0xbd   : > { %v252_v40 = vpop.f32.mrf.mxu2 }
  0xbe   : > { %352 = vmatpush.msrb.mxu3 %v252_v40 }
 0x13a   : > { %v286_v11 = vpop.f32.mrf.mxu3 }
 0x13b   : > { %vm289_vm2 = vcmp.ne.f32.partialorder %v286_v11, 0.0 }
 0x13c   : > { %v290_v13 = vsel %vm289_vm2, 1, %v671_v12 }
 0x13d   : > { %v292_v14 = vsel %vm291_vm1, %v290_v13, 0 }
 0x13e   : > { %v294_v15 = vshrl.u32 %v292_v14, 16  ;;  %v293_v17 = vand.u32 65535, %v292_v14 }
 0x140   : > { %v296_v16 = vcvt.s32.f32 %v294_v15  ;;  %v295_v18 = vcvt.s32.f32 %v293_v17 }
 0x142   : > { %299 = vadd.xlane.f32.xlu0 %v296_v16 }
 0x14a   : > { %297 = vadd.xlane.f32.xlu0 %v295_v18 }
 0x1b5   : > { %v300_v19 = vpop.xlane.xlu0 %299 }
 0x1b6   : > { %v302_v20 = vcvt.f32.s32 %v300_v19 }
 0x1b8   : > { %v303_v23 = vshll.u32 %v302_v20, 16 }
 0x1bd   : > { %v298_v22 = vpop.xlane.xlu0 %297 }
 0x1be   : > { %v301_v24 = vcvt.f32.s32 %v298_v22 }
 0x1c0   : > { %v304_v27 = vadd.s32 %v303_v23, %v301_v24 }
 0x1c2   : > { %v305_v28 = vperm.slane %v304_v27, 0 }
 0x1c4   : > { %vm306_vm4 = vcmp.ge.s32.totalorder %v261_v26, %v305_v28 }
 0x1c5   : > { %vm307_vm6 = vmor %vm262_vm3, %vm306_vm4 }
 0x1c6   : > { %v308_v29 = vsel %vm307_vm6, -inf, %v286_v11 }
 0x1c7   : > { %v310_v30 = vsel %vm309_vm5, %v308_v29, -inf }
 0x1c8   : > { %311 = vmax.xlane.f32.xlu1 %v310_v30 }
 0x23b   : > { %v312_v35 = vpop.xlane.xlu1 %311 }
 0x23c   : > { %v313_v36 = vsub.f32 %v308_v29, %v312_v35 }
 0x23e   : > { %v314_v37 = vmul.f32 1.442695, %v313_v36 }
 0x240   : > { %532 = vpow2.f32 %v314_v37 }
 0x246   : > { %v533_v38 = vpop.eup %532 }
 0x247   : > { %v316_v39 = vsel %vm309_vm5, %v533_v38, 0.0 }
 0x248   : > { %317 = vadd.xlane.f32.xlu1 %v316_v39 }
 0x2bb   : > { %v318_v41 = vpop.xlane.xlu1 %317 }
 0x2bc   : > { %534 = vrcp.f32 %v318_v41  ;;  %v330_v45 = vand.u32 2147483648, %v318_v41  ;;  %v328_v47 = vand.u32 2147483647, %v318_v41  ;;  %vm324_vm8 = vweird.f32 %v318_v41 }
 0x2be   : > { %v331_v49 = vor.u32 1.1754944e-38, %v330_v45  ;;  %vm329_vm10 = vcmp.eq.f32.partialorder %v328_v47, 8.507059e+37 }
 0x2c2   : > { %v535_v42 = vpop.eup %534 }
 0x2c3   : > { %v320_v43 = vmul.f32 %v535_v42, %v318_v41  ;;  %vm325_vm7 = vweird.f32 %v535_v42 }
 0x2c4   : > { %vm326_vm9 = vmor %vm324_vm8, %vm325_vm7 }
 0x2c5   : > { %v321_v44 = vsub.f32 1.0, %v320_v43 }
 0x2c7   : > { %v322_v46 = vmul.f32 %v535_v42, %v321_v44 }
 0x2c9   : > { %v323_v48 = vadd.f32 %v535_v42, %v322_v46 }
 0x2cb   : > { %v327_v50 = vsel %vm326_vm9, %v535_v42, %v323_v48 }
 0x2cc   : > { %v332_v51 = vsel %vm329_vm10, %v331_v49, %v327_v50 }
 0x2cd   : > { %v333_v52 = vmul.f32 %v533_v38, %v332_v51 }
 0x2cf   : > { %467 = vmatmul.msk.f32.vlgmr.msrb.gmra.mxu3 %vm309_vm5, %v333_v52 }
 0x352   : > { %v354_v53 = vpop.f32.mrf.mxu3 }
 0x353   : > { %357 = vst.msk [vmem:[%s177_s13] sm:$0xff] %vm191_vm0, %v354_v53 }
 0x354   : > { %623 = shalt.err (!%p620_p9)
}
 0x355   : > { %478 = dma.vmem_to_hbm [thread:$0]  (%p747_p13), %s372_s14, 128, %s374_s15, %s359_s18  }
 0x356 PF: > { %s385_s3 = sand.u32 1, %s654_s9   ;;  %p842_p10 = scmp.ge.s32.totalorder %s666_s12, 2 }
 0x357   : > { %s386_s29 = scalar_lea.sflag [#allocation5], %s385_s3 }
 0x358   : > { %p489_p11 = pnand %p842_p10, %p752_p4 }
 0x35a   : > { %p490_p0 = pneg %p489_p11 }
 0x35c   : > { %649 = dma.done.wait (%p490_p0), %s386_s29, 128  }
 0x35d   : > { %651 = vsyncadd (%p490_p0), %s386_s29, 4294967168  ;;  %p16_p2 = scmp.ge.s32.totalorder %s727_s23, 4   ;;  %s843_s9 = smov %s658_s10 }
 0x35e   : > { %s844_s10 = smov %s662_s11  ;;  %s845_s11 = smov %s739_s26 }
 0x35f   : > { %s846_s12 = smov %s727_s23  ;;  %18 = sbr.rel (!%p16_p2) target bundleno = 6 (0x6), region = 78 }
 0x364   :  { %392 = vsyncpa [#allocation4], 1 }
 0x365   :  { %394 = vsyncpa [#allocation4 + $0x1], 1 }
 0x366   :  { %395 = vsyncpa [#allocation7], 1 }
 0x367   :  { %396 = vsyncpa [#allocation5], 1 }
 0x368   :  { %398 = vsyncpa [#allocation5 + $0x1], 1 }

</bundles_post_ra>
